<compile_context>
chip_gen: v7x
topology: tpu7x:2x2x1
jax: 0.10.0
libtpu: 0.0.40
codegen_flags: <defaults>
</compile_context>

<pallas_src>
import functools
import numpy as np
import jax
import jax.numpy as jnp
from jax import lax
from jax.experimental import pallas as pl
from jax.experimental.pallas import tpu as pltpu

EPS = 1e-6


# ----------------------------------------------------------------------------
# Kernel
# ----------------------------------------------------------------------------
def _layer_norm(x, g, b):
    mean = jnp.mean(x, axis=-1, keepdims=True)
    var = jnp.mean((x - mean) ** 2, axis=-1, keepdims=True)
    return (x - mean) * lax.rsqrt(var + EPS) * g + b


def encoder_kernel(emb_ref, pos_ref, bias_ref,
                   ln0_g_ref, ln0_b_ref,
                   wqkv_ref, wo_ref,
                   ln1_g_ref, ln1_b_ref,
                   w1_ref, b1_ref, w2_ref, b2_ref,
                   ln2_g_ref, ln2_b_ref,
                   o_ref,
                   *, n_head, d_k, d_v):
    """One (batch b, layer l) grid step.

    The activation lives in the resident (S, D) output block for every l of a
    given b (output index_map ignores l); per-layer weights are streamed over
    the inner "arbitrary" l axis.
    """
    l = pl.program_id(1)

    # Layer-0 prologue: embedding + positional encoding, then first LayerNorm.
    # (dropout omitted: eval mode.)
    @pl.when(l == 0)
    def _():
        x0 = emb_ref[...] + pos_ref[...]
        o_ref[...] = _layer_norm(x0, ln0_g_ref[...], ln0_b_ref[...])

    x = o_ref[...]                                         # (S, D), VMEM-resident

    # ------------------- multi-head self-attention -------------------
    # Single fused QKV projection: (S, D) @ (D, H*(2*dk+dv)).
    qkv = jnp.dot(x, wqkv_ref[...], preferred_element_type=jnp.float32)
    bias = bias_ref[...]                                   # (1, S) additive mask

    k_off = n_head * d_k
    v_off = 2 * n_head * d_k
    heads = []
    for h in range(n_head):                                # static, tiny H
        q = qkv[:, h * d_k:(h + 1) * d_k]                  # 1/sqrt(dk) folded in
        k = qkv[:, k_off + h * d_k:k_off + (h + 1) * d_k]
        v = qkv[:, v_off + h * d_v:v_off + (h + 1) * d_v]
        # scores = q @ k.T without materializing a transpose
        s = lax.dot_general(q, k, (((1,), (1,)), ((), ())),
                            preferred_element_type=jnp.float32)    # (S, S)
        s = s + bias
        m = jnp.max(s, axis=-1, keepdims=True)
        e = jnp.exp(s - m)
        denom = jnp.sum(e, axis=-1, keepdims=True)         # >= 1 (max term = 1)
        r0 = pl.reciprocal(denom, approx=True)             # EUP seed
        r = r0 * (2.0 - denom * r0)                        # one Newton step
        heads.append(jnp.dot(e * r, v, preferred_element_type=jnp.float32))
    attn = jnp.concatenate(heads, axis=-1)                 # (S, H*dv)
    attn = jnp.dot(attn, wo_ref[...], preferred_element_type=jnp.float32)
    x = _layer_norm(attn + x, ln1_g_ref[...], ln1_b_ref[...])

    # ------------------------ position-wise FFN ------------------------
    hdn = jnp.dot(x, w1_ref[...], preferred_element_type=jnp.float32) + b1_ref[...]
    hdn = jnp.maximum(hdn, 0.0)
    ffn = jnp.dot(hdn, w2_ref[...], preferred_element_type=jnp.float32) + b2_ref[...]
    o_ref[...] = _layer_norm(ffn + x, ln2_g_ref[...], ln2_b_ref[...])


# ----------------------------------------------------------------------------
# One-time weight stacking (hoisted out of the forward call)
# ----------------------------------------------------------------------------
def stack_encoder_params(params, *, d_k):
    inv_temp = 1.0 / (d_k ** 0.5)

    def stack(name):
        return jnp.stack([lp[name] for lp in params["layers"]], axis=0)

    wq = stack("wq") * inv_temp          # fold 1/sqrt(d_k) into the Q projection
    wqkv = jnp.concatenate([wq, stack("wk"), stack("wv")], axis=-1)
    return {
        "emb": params["emb"],
        "pos_table": params["pos_table"],
        "ln0_g": params["ln_g"], "ln0_b": params["ln_b"],
        "wqkv": wqkv,                    # (L, D, H*(2*dk+dv))
        "wo": stack("wo"),               # (L, H*dv, D)
        "ln1_g": stack("ln1_g"), "ln1_b": stack("ln1_b"),
        "w1": stack("w1"), "b1": stack("b1"),
        "w2": stack("w2"), "b2": stack("b2"),
        "ln2_g": stack("ln2_g"), "ln2_b": stack("ln2_b"),
    }


# ----------------------------------------------------------------------------
# Jitted forward wrapper
# ----------------------------------------------------------------------------
@functools.partial(jax.jit,
                   static_argnames=("n_head", "d_k", "d_v", "scale_emb", "d_model"))
def encoder_forward(src_seq, src_mask, stacked, *, n_head, d_k, d_v,
                    scale_emb, d_model):
    B, S = src_seq.shape
    D = d_model
    L, _, W = stacked["wqkv"].shape
    d_inner = stacked["w1"].shape[-1]
    HV = n_head * d_v

    # TODO(synk): data-dependent embedding gather stays in plain JAX.
    emb = jnp.take(stacked["emb"], src_seq, axis=0)        # (B, S, D)
    if scale_emb:
        emb = emb * (d_model ** 0.5)
    pos = stacked["pos_table"][0, :S, :]                   # (S, D), shared by all b
    # additive attention-mask bias: 0.0 = keep, -1e9 = masked.  (B, 1, S)
    bias = (src_mask.astype(jnp.float32) - 1.0) * 1e9

    kern = functools.partial(encoder_kernel, n_head=n_head, d_k=d_k, d_v=d_v)

    full2 = lambda b, l: (0, 0)
    per_b = lambda b, l: (b, 0, 0)
    per_l = lambda b, l: (l, 0, 0)

    in_specs = [
        pl.BlockSpec((None, S, D), per_b),          # emb            (B, S, D)
        pl.BlockSpec((S, D), full2),                # pos table      (S, D)
        pl.BlockSpec((None, 1, S), per_b),          # mask bias      (B, 1, S)
        pl.BlockSpec((1, D), full2),                # ln0 gamma
        pl.BlockSpec((1, D), full2),                # ln0 beta
        pl.BlockSpec((None, D, W), per_l),          # fused QKV weight
        pl.BlockSpec((None, HV, D), per_l),         # output projection
        pl.BlockSpec((None, 1, D), per_l),          # ln1 gamma
        pl.BlockSpec((None, 1, D), per_l),          # ln1 beta
        pl.BlockSpec((None, D, d_inner), per_l),    # ffn w1
        pl.BlockSpec((None, 1, d_inner), per_l),    # ffn b1
        pl.BlockSpec((None, d_inner, D), per_l),    # ffn w2
        pl.BlockSpec((None, 1, D), per_l),          # ffn b2
        pl.BlockSpec((None, 1, D), per_l),          # ln2 gamma
        pl.BlockSpec((None, 1, D), per_l),          # ln2 beta
    ]
    out_specs = pl.BlockSpec((None, S, D), per_b)   # resident across l

    out = pl.pallas_call(
        kern,
        out_shape=jax.ShapeDtypeStruct((B, S, D), jnp.float32),
        grid_spec=pltpu.PrefetchScalarGridSpec(
            num_scalar_prefetch=0,
            grid=(B, L),
            in_specs=in_specs,
            out_specs=out_specs),
        compiler_params=pltpu.CompilerParams(
            dimension_semantics=("parallel", "arbitrary"),
            # Re-derive per generation; 32 MiB is safe on v5e/v6e/v7x and is
            # above the 16 MiB v5e default scoped limit.
            vmem_limit_bytes=32 * 1024 * 1024),
    )(emb, pos, bias,
      stacked["ln0_g"], stacked["ln0_b"],
      stacked["wqkv"], stacked["wo"],
      stacked["ln1_g"], stacked["ln1_b"],
      stacked["w1"], stacked["b1"], stacked["w2"], stacked["b2"],
      stacked["ln2_g"], stacked["ln2_b"])
    return (out,)


# ----------------------------------------------------------------------------
# Pure-JAX reference (for correctness check)
# ----------------------------------------------------------------------------
def ref_encoder(src_seq, src_mask, params, *, n_head, d_k, d_v, scale_emb, d_model):
    def ln(x, g, b):
        mean = jnp.mean(x, -1, keepdims=True)
        var = jnp.mean((x - mean) ** 2, -1, keepdims=True)
        return (x - mean) / jnp.sqrt(var + EPS) * g + b

    B, S = src_seq.shape
    x = jnp.take(params["emb"], src_seq, axis=0)
    if scale_emb:
        x = x * (d_model ** 0.5)
    x = x + params["pos_table"][:, :S, :]
    x = ln(x, params["ln_g"][0], params["ln_b"][0])
    for lp in params["layers"]:
        residual = x
        q = (x @ lp["wq"]).reshape(B, S, n_head, d_k).transpose(0, 2, 1, 3)
        k = (x @ lp["wk"]).reshape(B, S, n_head, d_k).transpose(0, 2, 1, 3)
        v = (x @ lp["wv"]).reshape(B, S, n_head, d_v).transpose(0, 2, 1, 3)
        s = jnp.einsum("bhqd,bhkd->bhqk", q, k) / (d_k ** 0.5)
        s = jnp.where(src_mask[:, None, :, :] > 0, s, -1e9)
        p = jax.nn.softmax(s, axis=-1)
        o = jnp.einsum("bhqk,bhkd->bhqd", p, v).transpose(0, 2, 1, 3).reshape(B, S, -1)
        x = ln(o @ lp["wo"] + residual, lp["ln1_g"][0], lp["ln1_b"][0])
        residual2 = x
        h = jax.nn.relu(x @ lp["w1"] + lp["b1"][0])
        f = h @ lp["w2"] + lp["b2"][0]
        x = ln(f + residual2, lp["ln2_g"][0], lp["ln2_b"][0])
    return x


# ----------------------------------------------------------------------------
# Deterministic parameter init / sinusoid table
# ----------------------------------------------------------------------------
def sinusoid_table(n_position, d_hid):
    pos = np.arange(n_position)[:, None].astype(np.float64)
    hid = np.arange(d_hid)[None, :]
    angle = pos / np.power(10000, 2 * (hid // 2) / d_hid)
    table = np.zeros((n_position, d_hid), dtype=np.float64)
    table[:, 0::2] = np.sin(angle[:, 0::2])
    table[:, 1::2] = np.cos(angle[:, 1::2])
    return jnp.asarray(table[None, :, :], dtype=jnp.float32)   # (1, n_pos, d_hid)


def init_params(key, n_src_vocab, d_model, n_layers, n_head, d_k, d_v, d_inner,
                pad_idx, n_position):
    keys = jax.random.split(key, 2 + 8 * n_layers)
    ki = iter(keys)
    emb = jax.random.normal(next(ki), (n_src_vocab, d_model), jnp.float32) * 0.02
    emb = emb.at[pad_idx].set(0.0)
    params = {
        "emb": emb,
        "pos_table": sinusoid_table(n_position, d_model),
        "ln_g": jnp.ones((1, d_model), jnp.float32),
        "ln_b": jnp.zeros((1, d_model), jnp.float32),
        "layers": [],
    }
    for _ in range(n_layers):
        lp = {
            "wq": jax.random.normal(next(ki), (d_model, n_head * d_k), jnp.float32) * 0.05,
            "wk": jax.random.normal(next(ki), (d_model, n_head * d_k), jnp.float32) * 0.05,
            "wv": jax.random.normal(next(ki), (d_model, n_head * d_v), jnp.float32) * 0.05,
            "wo": jax.random.normal(next(ki), (n_head * d_v, d_model), jnp.float32) * 0.05,
            "ln1_g": jnp.ones((1, d_model), jnp.float32),
            "ln1_b": jnp.zeros((1, d_model), jnp.float32),
            "w1": jax.random.normal(next(ki), (d_model, d_inner), jnp.float32) * 0.05,
            "b1": jax.random.normal(next(ki), (1, d_inner), jnp.float32) * 0.01,
            "w2": jax.random.normal(next(ki), (d_inner, d_model), jnp.float32) * 0.05,
            "b2": jax.random.normal(next(ki), (1, d_model), jnp.float32) * 0.01,
            "ln2_g": jnp.ones((1, d_model), jnp.float32),
            "ln2_b": jnp.zeros((1, d_model), jnp.float32),
        }
        params["layers"].append(lp)
    return params


# ----------------------------------------------------------------------------
if __name__ == "__main__":
    # small config consistent with the module
    n_src_vocab, d_model, d_inner = 50, 32, 64
    n_layers, n_head, d_k, d_v = 2, 2, 16, 16
    pad_idx, n_position = 0, 64
    B, S = 2, 8
    scale_emb = False

    key = jax.random.PRNGKey(0)
    pkey, skey = jax.random.split(key)
    params = init_params(pkey, n_src_vocab, d_model, n_layers, n_head, d_k, d_v,
                         d_inner, pad_idx, n_position)
    stacked = stack_encoder_params(params, d_k=d_k)          # one-time restack

    src_seq = jax.random.randint(skey, (B, S), 1, n_src_vocab, dtype=jnp.int32)
    src_seq = src_seq.at[1, 6:].set(pad_idx)                 # some padding
    src_mask = (src_seq != pad_idx)[:, None, :].astype(jnp.float32)  # (B, 1, S)

    (enc_out,) = encoder_forward(src_seq, src_mask, stacked,
                                 n_head=n_head, d_k=d_k, d_v=d_v,
                                 scale_emb=scale_emb, d_model=d_model)
    enc_out = jax.block_until_ready(enc_out)

    ref_out = ref_encoder(src_seq, src_mask, params,
                          n_head=n_head, d_k=d_k, d_v=d_v,
                          scale_emb=scale_emb, d_model=d_model)
    np.testing.assert_allclose(np.asarray(enc_out), np.asarray(ref_out),
                               rtol=1e-3, atol=1e-3)
    print("KERNEL_OK")
</pallas_src>

<mosaic_0001>
module attributes {stable_mosaic.version = 11 : i64} {
  func.func @encoder_kernel(%arg0: i32, %arg1: i32, %arg2: memref<1x8x32xf32, #tpu.memory_space<vmem>>, %arg3: memref<8x32xf32, #tpu.memory_space<vmem>>, %arg4: memref<1x1x8xf32, #tpu.memory_space<vmem>>, %arg5: memref<1x32xf32, #tpu.memory_space<vmem>>, %arg6: memref<1x32xf32, #tpu.memory_space<vmem>>, %arg7: memref<1x32x96xf32, #tpu.memory_space<vmem>>, %arg8: memref<1x32x32xf32, #tpu.memory_space<vmem>>, %arg9: memref<1x1x32xf32, #tpu.memory_space<vmem>>, %arg10: memref<1x1x32xf32, #tpu.memory_space<vmem>>, %arg11: memref<1x32x64xf32, #tpu.memory_space<vmem>>, %arg12: memref<1x1x64xf32, #tpu.memory_space<vmem>>, %arg13: memref<1x64x32xf32, #tpu.memory_space<vmem>>, %arg14: memref<1x1x32xf32, #tpu.memory_space<vmem>>, %arg15: memref<1x1x32xf32, #tpu.memory_space<vmem>>, %arg16: memref<1x1x32xf32, #tpu.memory_space<vmem>>, %arg17: memref<1x8x32xf32, #tpu.memory_space<vmem>>) attributes {dimension_semantics = [#tpu.dimension_semantics<parallel>, #tpu.dimension_semantics<arbitrary>], iteration_bounds = array<i64: 2, 2>, scalar_prefetch = 0 : i64, scratch_operands = 0 : i64, tpu.core_type = #tpu.core_type<tc>, window_params = [{transform_indices = @transform_0, window_bounds = array<i64: 1, 8, 32>}, {pipeline_mode = #tpu.pipeline_mode<synchronous>, transform_indices = @transform_1, window_bounds = array<i64: 8, 32>}, {transform_indices = @transform_2, window_bounds = array<i64: 1, 1, 8>}, {pipeline_mode = #tpu.pipeline_mode<synchronous>, transform_indices = @transform_3, window_bounds = array<i64: 1, 32>}, {pipeline_mode = #tpu.pipeline_mode<synchronous>, transform_indices = @transform_4, window_bounds = array<i64: 1, 32>}, {transform_indices = @transform_5, window_bounds = array<i64: 1, 32, 96>}, {transform_indices = @transform_6, window_bounds = array<i64: 1, 32, 32>}, {transform_indices = @transform_7, window_bounds = array<i64: 1, 1, 32>}, {transform_indices = @transform_8, window_bounds = array<i64: 1, 1, 32>}, {transform_indices = @transform_9, window_bounds = array<i64: 1, 32, 64>}, {transform_indices = @transform_10, window_bounds = array<i64: 1, 1, 64>}, {transform_indices = @transform_11, window_bounds = array<i64: 1, 64, 32>}, {transform_indices = @transform_12, window_bounds = array<i64: 1, 1, 32>}, {transform_indices = @transform_13, window_bounds = array<i64: 1, 1, 32>}, {transform_indices = @transform_14, window_bounds = array<i64: 1, 1, 32>}, {transform_indices = @transform_15, window_bounds = array<i64: 1, 8, 32>}]} {
    %c0_i32 = arith.constant 0 : i32
    %0 = arith.cmpi eq, %arg1, %c0_i32 : i32
    %1 = arith.extui %0 : i1 to i32
    %c0_i32_0 = arith.constant 0 : i32
    %2 = arith.cmpi ne, %1, %c0_i32_0 : i32
    scf.if %2 {
      %c0_63 = arith.constant 0 : index
      %c0_64 = arith.constant 0 : index
      %c0_65 = arith.constant 0 : index
      %129 = vector.load %arg2[%c0_63, %c0_64, %c0_65] : memref<1x8x32xf32, #tpu.memory_space<vmem>>, vector<1x8x32xf32>
      %130 = vector.shape_cast %129 : vector<1x8x32xf32> to vector<8x32xf32>
      %c0_66 = arith.constant 0 : index
      %c0_67 = arith.constant 0 : index
      %131 = vector.load %arg3[%c0_66, %c0_67] : memref<8x32xf32, #tpu.memory_space<vmem>>, vector<8x32xf32>
      %132 = arith.addf %130, %131 : vector<8x32xf32>
      %c0_68 = arith.constant 0 : index
      %c0_69 = arith.constant 0 : index
      %133 = vector.load %arg5[%c0_68, %c0_69] : memref<1x32xf32, #tpu.memory_space<vmem>>, vector<1x32xf32>
      %c0_70 = arith.constant 0 : index
      %c0_71 = arith.constant 0 : index
      %134 = vector.load %arg6[%c0_70, %c0_71] : memref<1x32xf32, #tpu.memory_space<vmem>>, vector<1x32xf32>
      %cst_72 = arith.constant dense<0.000000e+00> : vector<8xf32>
      %135 = vector.multi_reduction <add>, %132, %cst_72 [1] : vector<8x32xf32> to vector<8xf32>
      %136 = vector.shape_cast %135 : vector<8xf32> to vector<8x1xf32>
      %cst_73 = arith.constant 3.200000e+01 : f32
      %137 = vector.broadcast %cst_73 : f32 to vector<8x1xf32>
      %138 = arith.divf %136, %137 : vector<8x1xf32>
      %139 = vector.broadcast %138 : vector<8x1xf32> to vector<8x32xf32>
      %140 = arith.subf %132, %139 : vector<8x32xf32>
      %141 = arith.mulf %140, %140 : vector<8x32xf32>
      %cst_74 = arith.constant dense<0.000000e+00> : vector<8xf32>
      %142 = vector.multi_reduction <add>, %141, %cst_74 [1] : vector<8x32xf32> to vector<8xf32>
      %143 = vector.shape_cast %142 : vector<8xf32> to vector<8x1xf32>
      %cst_75 = arith.constant 3.200000e+01 : f32
      %144 = vector.broadcast %cst_75 : f32 to vector<8x1xf32>
      %145 = arith.divf %143, %144 : vector<8x1xf32>
      %146 = vector.broadcast %138 : vector<8x1xf32> to vector<8x32xf32>
      %147 = arith.subf %132, %146 : vector<8x32xf32>
      %cst_76 = arith.constant 9.99999997E-7 : f32
      %148 = vector.broadcast %cst_76 : f32 to vector<8x1xf32>
      %149 = arith.addf %145, %148 : vector<8x1xf32>
      %150 = math.rsqrt %149 : vector<8x1xf32>
      %151 = vector.broadcast %150 : vector<8x1xf32> to vector<8x32xf32>
      %152 = arith.mulf %147, %151 : vector<8x32xf32>
      %153 = vector.broadcast %133 : vector<1x32xf32> to vector<8x32xf32>
      %154 = arith.mulf %152, %153 : vector<8x32xf32>
      %155 = vector.broadcast %134 : vector<1x32xf32> to vector<8x32xf32>
      %156 = arith.addf %154, %155 : vector<8x32xf32>
      %c0_77 = arith.constant 0 : index
      %c0_78 = arith.constant 0 : index
      %c0_79 = arith.constant 0 : index
      %157 = vector.load %arg17[%c0_77, %c0_78, %c0_79] : memref<1x8x32xf32, #tpu.memory_space<vmem>>, vector<1x8x32xf32>
      %158 = vector.shape_cast %157 : vector<1x8x32xf32> to vector<8x32xf32>
      %159 = vector.shape_cast %156 : vector<8x32xf32> to vector<1x8x32xf32>
      tpu.vector_store %arg17[%c0_77, %c0_78, %c0_79], %159 {strides = array<i32>} : memref<1x8x32xf32, #tpu.memory_space<vmem>>, vector<1x8x32xf32>,
    } else {
    }
    %c0 = arith.constant 0 : index
    %c0_1 = arith.constant 0 : index
    %c0_2 = arith.constant 0 : index
    %3 = vector.load %arg17[%c0, %c0_1, %c0_2] : memref<1x8x32xf32, #tpu.memory_space<vmem>>, vector<1x8x32xf32>
    %4 = vector.shape_cast %3 : vector<1x8x32xf32> to vector<8x32xf32>
    %c0_3 = arith.constant 0 : index
    %c0_4 = arith.constant 0 : index
    %c0_5 = arith.constant 0 : index
    %5 = vector.load %arg7[%c0_3, %c0_4, %c0_5] : memref<1x32x96xf32, #tpu.memory_space<vmem>>, vector<1x32x96xf32>
    %6 = vector.shape_cast %5 : vector<1x32x96xf32> to vector<32x96xf32>
    %cst = arith.constant dense<0.000000e+00> : vector<8x96xf32>
    %7 = tpu.matmul %4, %6, %cst {dimension_numbers = #tpu.dot_dimension_numbers<[1], [0], [0], [1], [0, 0, 1, 1], [], []>} : vector<8x32xf32>, vector<32x96xf32>, vector<8x96xf32> -> vector<8x96xf32>
    %c0_6 = arith.constant 0 : index
    %c0_7 = arith.constant 0 : index
    %c0_8 = arith.constant 0 : index
    %8 = vector.load %arg4[%c0_6, %c0_7, %c0_8] : memref<1x1x8xf32, #tpu.memory_space<vmem>>, vector<1x1x8xf32>
    %9 = vector.shape_cast %8 : vector<1x1x8xf32> to vector<1x8xf32>
    %10 = vector.extract_strided_slice %7 {offsets = [0, 0], sizes = [8, 16], strides = [1, 1]} : vector<8x96xf32> to vector<8x16xf32>
    %11 = vector.extract_strided_slice %7 {offsets = [0, 32], sizes = [8, 16], strides = [1, 1]} : vector<8x96xf32> to vector<8x16xf32>
    %12 = vector.extract_strided_slice %7 {offsets = [0, 64], sizes = [8, 16], strides = [1, 1]} : vector<8x96xf32> to vector<8x16xf32>
    %cst_9 = arith.constant dense<0.000000e+00> : vector<8x8xf32>
    %13 = tpu.matmul %10, %11, %cst_9 {dimension_numbers = #tpu.dot_dimension_numbers<[1], [1], [0], [0], [0, 0, 1, 0], [], []>} : vector<8x16xf32>, vector<8x16xf32>, vector<8x8xf32> -> vector<8x8xf32>
    %14 = vector.broadcast %9 : vector<1x8xf32> to vector<8x8xf32>
    %15 = arith.addf %13, %14 : vector<8x8xf32>
    %cst_10 = arith.constant dense<0xFF800000> : vector<8xf32>
    %16 = vector.multi_reduction <maximumf>, %15, %cst_10 [1] : vector<8x8xf32> to vector<8xf32>
    %17 = vector.shape_cast %16 : vector<8xf32> to vector<8x1xf32>
    %18 = vector.broadcast %17 : vector<8x1xf32> to vector<8x8xf32>
    %19 = arith.subf %15, %18 : vector<8x8xf32>
    %20 = math.exp %19 : vector<8x8xf32>
    %cst_11 = arith.constant dense<0.000000e+00> : vector<8xf32>
    %21 = vector.multi_reduction <add>, %20, %cst_11 [1] : vector<8x8xf32> to vector<8xf32>
    %22 = vector.shape_cast %21 : vector<8xf32> to vector<8x1xf32>
    %23 = tpu.reciprocal %22 {approx = true} : vector<8x1xf32> -> vector<8x1xf32>
    %24 = arith.mulf %22, %23 : vector<8x1xf32>
    %cst_12 = arith.constant 2.000000e+00 : f32
    %25 = vector.broadcast %cst_12 : f32 to vector<8x1xf32>
    %26 = arith.subf %25, %24 : vector<8x1xf32>
    %27 = arith.mulf %23, %26 : vector<8x1xf32>
    %28 = vector.broadcast %27 : vector<8x1xf32> to vector<8x8xf32>
    %29 = arith.mulf %20, %28 : vector<8x8xf32>
    %cst_13 = arith.constant dense<0.000000e+00> : vector<8x16xf32>
    %30 = tpu.matmul %29, %12, %cst_13 {dimension_numbers = #tpu.dot_dimension_numbers<[1], [0], [0], [1], [0, 0, 1, 1], [], []>} : vector<8x8xf32>, vector<8x16xf32>, vector<8x16xf32> -> vector<8x16xf32>
    %31 = vector.extract_strided_slice %7 {offsets = [0, 16], sizes = [8, 16], strides = [1, 1]} : vector<8x96xf32> to vector<8x16xf32>
    %32 = vector.extract_strided_slice %7 {offsets = [0, 48], sizes = [8, 16], strides = [1, 1]} : vector<8x96xf32> to vector<8x16xf32>
    %33 = vector.extract_strided_slice %7 {offsets = [0, 80], sizes = [8, 16], strides = [1, 1]} : vector<8x96xf32> to vector<8x16xf32>
    %cst_14 = arith.constant dense<0.000000e+00> : vector<8x8xf32>
    %34 = tpu.matmul %31, %32, %cst_14 {dimension_numbers = #tpu.dot_dimension_numbers<[1], [1], [0], [0], [0, 0, 1, 0], [], []>} : vector<8x16xf32>, vector<8x16xf32>, vector<8x8xf32> -> vector<8x8xf32>
    %35 = vector.broadcast %9 : vector<1x8xf32> to vector<8x8xf32>
    %36 = arith.addf %34, %35 : vector<8x8xf32>
    %cst_15 = arith.constant dense<0xFF800000> : vector<8xf32>
    %37 = vector.multi_reduction <maximumf>, %36, %cst_15 [1] : vector<8x8xf32> to vector<8xf32>
    %38 = vector.shape_cast %37 : vector<8xf32> to vector<8x1xf32>
    %39 = vector.broadcast %38 : vector<8x1xf32> to vector<8x8xf32>
    %40 = arith.subf %36, %39 : vector<8x8xf32>
    %41 = math.exp %40 : vector<8x8xf32>
    %cst_16 = arith.constant dense<0.000000e+00> : vector<8xf32>
    %42 = vector.multi_reduction <add>, %41, %cst_16 [1] : vector<8x8xf32> to vector<8xf32>
    %43 = vector.shape_cast %42 : vector<8xf32> to vector<8x1xf32>
    %44 = tpu.reciprocal %43 {approx = true} : vector<8x1xf32> -> vector<8x1xf32>
    %45 = arith.mulf %43, %44 : vector<8x1xf32>
    %cst_17 = arith.constant 2.000000e+00 : f32
    %46 = vector.broadcast %cst_17 : f32 to vector<8x1xf32>
    %47 = arith.subf %46, %45 : vector<8x1xf32>
    %48 = arith.mulf %44, %47 : vector<8x1xf32>
    %49 = vector.broadcast %48 : vector<8x1xf32> to vector<8x8xf32>
    %50 = arith.mulf %41, %49 : vector<8x8xf32>
    %cst_18 = arith.constant dense<0.000000e+00> : vector<8x16xf32>
    %51 = tpu.matmul %50, %33, %cst_18 {dimension_numbers = #tpu.dot_dimension_numbers<[1], [0], [0], [1], [0, 0, 1, 1], [], []>} : vector<8x8xf32>, vector<8x16xf32>, vector<8x16xf32> -> vector<8x16xf32>
    %52 = tpu.concatenate %30, %51 in 1 : vector<8x16xf32>, vector<8x16xf32> -> vector<8x32xf32>
    %c0_19 = arith.constant 0 : index
    %c0_20 = arith.constant 0 : index
    %c0_21 = arith.constant 0 : index
    %53 = vector.load %arg8[%c0_19, %c0_20, %c0_21] : memref<1x32x32xf32, #tpu.memory_space<vmem>>, vector<1x32x32xf32>
    %54 = vector.shape_cast %53 : vector<1x32x32xf32> to vector<32x32xf32>
    %cst_22 = arith.constant dense<0.000000e+00> : vector<8x32xf32>
    %55 = tpu.matmul %52, %54, %cst_22 {dimension_numbers = #tpu.dot_dimension_numbers<[1], [0], [0], [1], [0, 0, 1, 1], [], []>} : vector<8x32xf32>, vector<32x32xf32>, vector<8x32xf32> -> vector<8x32xf32>
    %56 = arith.addf %55, %4 : vector<8x32xf32>
    %c0_23 = arith.constant 0 : index
    %c0_24 = arith.constant 0 : index
    %c0_25 = arith.constant 0 : index
    %57 = vector.load %arg9[%c0_23, %c0_24, %c0_25] : memref<1x1x32xf32, #tpu.memory_space<vmem>>, vector<1x1x32xf32>
    %58 = vector.shape_cast %57 : vector<1x1x32xf32> to vector<1x32xf32>
    %c0_26 = arith.constant 0 : index
    %c0_27 = arith.constant 0 : index
    %c0_28 = arith.constant 0 : index
    %59 = vector.load %arg10[%c0_26, %c0_27, %c0_28] : memref<1x1x32xf32, #tpu.memory_space<vmem>>, vector<1x1x32xf32>
    %60 = vector.shape_cast %59 : vector<1x1x32xf32> to vector<1x32xf32>
    %cst_29 = arith.constant dense<0.000000e+00> : vector<8xf32>
    %61 = vector.multi_reduction <add>, %56, %cst_29 [1] : vector<8x32xf32> to vector<8xf32>
    %62 = vector.shape_cast %61 : vector<8xf32> to vector<8x1xf32>
    %cst_30 = arith.constant 3.200000e+01 : f32
    %63 = vector.broadcast %cst_30 : f32 to vector<8x1xf32>
    %64 = arith.divf %62, %63 : vector<8x1xf32>
    %65 = vector.broadcast %64 : vector<8x1xf32> to vector<8x32xf32>
    %66 = arith.subf %56, %65 : vector<8x32xf32>
    %67 = arith.mulf %66, %66 : vector<8x32xf32>
    %cst_31 = arith.constant dense<0.000000e+00> : vector<8xf32>
    %68 = vector.multi_reduction <add>, %67, %cst_31 [1] : vector<8x32xf32> to vector<8xf32>
    %69 = vector.shape_cast %68 : vector<8xf32> to vector<8x1xf32>
    %cst_32 = arith.constant 3.200000e+01 : f32
    %70 = vector.broadcast %cst_32 : f32 to vector<8x1xf32>
    %71 = arith.divf %69, %70 : vector<8x1xf32>
    %72 = vector.broadcast %64 : vector<8x1xf32> to vector<8x32xf32>
    %73 = arith.subf %56, %72 : vector<8x32xf32>
    %cst_33 = arith.constant 9.99999997E-7 : f32
    %74 = vector.broadcast %cst_33 : f32 to vector<8x1xf32>
    %75 = arith.addf %71, %74 : vector<8x1xf32>
    %76 = math.rsqrt %75 : vector<8x1xf32>
    %77 = vector.broadcast %76 : vector<8x1xf32> to vector<8x32xf32>
    %78 = arith.mulf %73, %77 : vector<8x32xf32>
    %79 = vector.broadcast %58 : vector<1x32xf32> to vector<8x32xf32>
    %80 = arith.mulf %78, %79 : vector<8x32xf32>
    %81 = vector.broadcast %60 : vector<1x32xf32> to vector<8x32xf32>
    %82 = arith.addf %80, %81 : vector<8x32xf32>
    %c0_34 = arith.constant 0 : index
    %c0_35 = arith.constant 0 : index
    %c0_36 = arith.constant 0 : index
    %83 = vector.load %arg11[%c0_34, %c0_35, %c0_36] : memref<1x32x64xf32, #tpu.memory_space<vmem>>, vector<1x32x64xf32>
    %84 = vector.shape_cast %83 : vector<1x32x64xf32> to vector<32x64xf32>
    %cst_37 = arith.constant dense<0.000000e+00> : vector<8x64xf32>
    %85 = tpu.matmul %82, %84, %cst_37 {dimension_numbers = #tpu.dot_dimension_numbers<[1], [0], [0], [1], [0, 0, 1, 1], [], []>} : vector<8x32xf32>, vector<32x64xf32>, vector<8x64xf32> -> vector<8x64xf32>
    %c0_38 = arith.constant 0 : index
    %c0_39 = arith.constant 0 : index
    %c0_40 = arith.constant 0 : index
    %86 = vector.load %arg12[%c0_38, %c0_39, %c0_40] : memref<1x1x64xf32, #tpu.memory_space<vmem>>, vector<1x1x64xf32>
    %87 = vector.shape_cast %86 : vector<1x1x64xf32> to vector<1x64xf32>
    %88 = vector.broadcast %87 : vector<1x64xf32> to vector<8x64xf32>
    %89 = arith.addf %85, %88 : vector<8x64xf32>
    %cst_41 = arith.constant 0.000000e+00 : f32
    %90 = vector.broadcast %cst_41 : f32 to vector<8x64xf32>
    %91 = arith.maximumf %89, %90 : vector<8x64xf32>
    %c0_42 = arith.constant 0 : index
    %c0_43 = arith.constant 0 : index
    %c0_44 = arith.constant 0 : index
    %92 = vector.load %arg13[%c0_42, %c0_43, %c0_44] : memref<1x64x32xf32, #tpu.memory_space<vmem>>, vector<1x64x32xf32>
    %93 = vector.shape_cast %92 : vector<1x64x32xf32> to vector<64x32xf32>
    %cst_45 = arith.constant dense<0.000000e+00> : vector<8x32xf32>
    %94 = tpu.matmul %91, %93, %cst_45 {dimension_numbers = #tpu.dot_dimension_numbers<[1], [0], [0], [1], [0, 0, 1, 1], [], []>} : vector<8x64xf32>, vector<64x32xf32>, vector<8x32xf32> -> vector<8x32xf32>
    %c0_46 = arith.constant 0 : index
    %c0_47 = arith.constant 0 : index
    %c0_48 = arith.constant 0 : index
    %95 = vector.load %arg14[%c0_46, %c0_47, %c0_48] : memref<1x1x32xf32, #tpu.memory_space<vmem>>, vector<1x1x32xf32>
    %96 = vector.shape_cast %95 : vector<1x1x32xf32> to vector<1x32xf32>
    %97 = vector.broadcast %96 : vector<1x32xf32> to vector<8x32xf32>
    %98 = arith.addf %94, %97 : vector<8x32xf32>
    %99 = arith.addf %98, %82 : vector<8x32xf32>
    %c0_49 = arith.constant 0 : index
    %c0_50 = arith.constant 0 : index
    %c0_51 = arith.constant 0 : index
    %100 = vector.load %arg15[%c0_49, %c0_50, %c0_51] : memref<1x1x32xf32, #tpu.memory_space<vmem>>, vector<1x1x32xf32>
    %101 = vector.shape_cast %100 : vector<1x1x32xf32> to vector<1x32xf32>
    %c0_52 = arith.constant 0 : index
    %c0_53 = arith.constant 0 : index
    %c0_54 = arith.constant 0 : index
    %102 = vector.load %arg16[%c0_52, %c0_53, %c0_54] : memref<1x1x32xf32, #tpu.memory_space<vmem>>, vector<1x1x32xf32>
    %103 = vector.shape_cast %102 : vector<1x1x32xf32> to vector<1x32xf32>
    %cst_55 = arith.constant dense<0.000000e+00> : vector<8xf32>
    %104 = vector.multi_reduction <add>, %99, %cst_55 [1] : vector<8x32xf32> to vector<8xf32>
    %105 = vector.shape_cast %104 : vector<8xf32> to vector<8x1xf32>
    %cst_56 = arith.constant 3.200000e+01 : f32
    %106 = vector.broadcast %cst_56 : f32 to vector<8x1xf32>
    %107 = arith.divf %105, %106 : vector<8x1xf32>
    %108 = vector.broadcast %107 : vector<8x1xf32> to vector<8x32xf32>
    %109 = arith.subf %99, %108 : vector<8x32xf32>
    %110 = arith.mulf %109, %109 : vector<8x32xf32>
    %cst_57 = arith.constant dense<0.000000e+00> : vector<8xf32>
    %111 = vector.multi_reduction <add>, %110, %cst_57 [1] : vector<8x32xf32> to vector<8xf32>
    %112 = vector.shape_cast %111 : vector<8xf32> to vector<8x1xf32>
    %cst_58 = arith.constant 3.200000e+01 : f32
    %113 = vector.broadcast %cst_58 : f32 to vector<8x1xf32>
    %114 = arith.divf %112, %113 : vector<8x1xf32>
    %115 = vector.broadcast %107 : vector<8x1xf32> to vector<8x32xf32>
    %116 = arith.subf %99, %115 : vector<8x32xf32>
    %cst_59 = arith.constant 9.99999997E-7 : f32
    %117 = vector.broadcast %cst_59 : f32 to vector<8x1xf32>
    %118 = arith.addf %114, %117 : vector<8x1xf32>
    %119 = math.rsqrt %118 : vector<8x1xf32>
    %120 = vector.broadcast %119 : vector<8x1xf32> to vector<8x32xf32>
    %121 = arith.mulf %116, %120 : vector<8x32xf32>
    %122 = vector.broadcast %101 : vector<1x32xf32> to vector<8x32xf32>
    %123 = arith.mulf %121, %122 : vector<8x32xf32>
    %124 = vector.broadcast %103 : vector<1x32xf32> to vector<8x32xf32>
    %125 = arith.addf %123, %124 : vector<8x32xf32>
    %c0_60 = arith.constant 0 : index
    %c0_61 = arith.constant 0 : index
    %c0_62 = arith.constant 0 : index
    %126 = vector.load %arg17[%c0_60, %c0_61, %c0_62] : memref<1x8x32xf32, #tpu.memory_space<vmem>>, vector<1x8x32xf32>
    %127 = vector.shape_cast %126 : vector<1x8x32xf32> to vector<8x32xf32>
    %128 = vector.shape_cast %125 : vector<8x32xf32> to vector<1x8x32xf32>
    tpu.vector_store %arg17[%c0_60, %c0_61, %c0_62], %128 {strides = array<i32>} : memref<1x8x32xf32, #tpu.memory_space<vmem>>, vector<1x8x32xf32>,
    return
  }
  func.func @transform_0(%arg0: i32, %arg1: i32) -> (i32, i32, i32) {
    %c0_i32 = arith.constant 0 : i32
    %c0_i32_0 = arith.constant 0 : i32
    %c0_i32_1 = arith.constant 0 : i32
    return %arg0, %c0_i32, %c0_i32_0 : i32, i32, i32
  }
  func.func @transform_1(%arg0: i32, %arg1: i32) -> (i32, i32) {
    %c0_i32 = arith.constant 0 : i32
    %c0_i32_0 = arith.constant 0 : i32
    %c0_i32_1 = arith.constant 0 : i32
    return %c0_i32, %c0_i32_0 : i32, i32
  }
  func.func @transform_2(%arg0: i32, %arg1: i32) -> (i32, i32, i32) {
    %c0_i32 = arith.constant 0 : i32
    %c0_i32_0 = arith.constant 0 : i32
    %c0_i32_1 = arith.constant 0 : i32
    return %arg0, %c0_i32, %c0_i32_0 : i32, i32, i32
  }
  func.func @transform_3(%arg0: i32, %arg1: i32) -> (i32, i32) {
    %c0_i32 = arith.constant 0 : i32
    %c0_i32_0 = arith.constant 0 : i32
    %c0_i32_1 = arith.constant 0 : i32
    return %c0_i32, %c0_i32_0 : i32, i32
  }
  func.func @transform_4(%arg0: i32, %arg1: i32) -> (i32, i32) {
    %c0_i32 = arith.constant 0 : i32
    %c0_i32_0 = arith.constant 0 : i32
    %c0_i32_1 = arith.constant 0 : i32
    return %c0_i32, %c0_i32_0 : i32, i32
  }
  func.func @transform_5(%arg0: i32, %arg1: i32) -> (i32, i32, i32) {
    %c0_i32 = arith.constant 0 : i32
    %c0_i32_0 = arith.constant 0 : i32
    %c0_i32_1 = arith.constant 0 : i32
    return %arg1, %c0_i32, %c0_i32_0 : i32, i32, i32
  }
  func.func @transform_6(%arg0: i32, %arg1: i32) -> (i32, i32, i32) {
    %c0_i32 = arith.constant 0 : i32
    %c0_i32_0 = arith.constant 0 : i32
    %c0_i32_1 = arith.constant 0 : i32
    return %arg1, %c0_i32, %c0_i32_0 : i32, i32, i32
  }
  func.func @transform_7(%arg0: i32, %arg1: i32) -> (i32, i32, i32) {
    %c0_i32 = arith.constant 0 : i32
    %c0_i32_0 = arith.constant 0 : i32
    %c0_i32_1 = arith.constant 0 : i32
    return %arg1, %c0_i32, %c0_i32_0 : i32, i32, i32
  }
  func.func @transform_8(%arg0: i32, %arg1: i32) -> (i32, i32, i32) {
    %c0_i32 = arith.constant 0 : i32
    %c0_i32_0 = arith.constant 0 : i32
    %c0_i32_1 = arith.constant 0 : i32
    return %arg1, %c0_i32, %c0_i32_0 : i32, i32, i32
  }
  func.func @transform_9(%arg0: i32, %arg1: i32) -> (i32, i32, i32) {
    %c0_i32 = arith.constant 0 : i32
    %c0_i32_0 = arith.constant 0 : i32
    %c0_i32_1 = arith.constant 0 : i32
    return %arg1, %c0_i32, %c0_i32_0 : i32, i32, i32
  }
  func.func @transform_10(%arg0: i32, %arg1: i32) -> (i32, i32, i32) {
    %c0_i32 = arith.constant 0 : i32
    %c0_i32_0 = arith.constant 0 : i32
    %c0_i32_1 = arith.constant 0 : i32
    return %arg1, %c0_i32, %c0_i32_0 : i32, i32, i32
  }
  func.func @transform_11(%arg0: i32, %arg1: i32) -> (i32, i32, i32) {
    %c0_i32 = arith.constant 0 : i32
    %c0_i32_0 = arith.constant 0 : i32
    %c0_i32_1 = arith.constant 0 : i32
    return %arg1, %c0_i32, %c0_i32_0 : i32, i32, i32
  }
  func.func @transform_12(%arg0: i32, %arg1: i32) -> (i32, i32, i32) {
    %c0_i32 = arith.constant 0 : i32
    %c0_i32_0 = arith.constant 0 : i32
    %c0_i32_1 = arith.constant 0 : i32
    return %arg1, %c0_i32, %c0_i32_0 : i32, i32, i32
  }
  func.func @transform_13(%arg0: i32, %arg1: i32) -> (i32, i32, i32) {
    %c0_i32 = arith.constant 0 : i32
    %c0_i32_0 = arith.constant 0 : i32
    %c0_i32_1 = arith.constant 0 : i32
    return %arg1, %c0_i32, %c0_i32_0 : i32, i32, i32
  }
  func.func @transform_14(%arg0: i32, %arg1: i32) -> (i32, i32, i32) {
    %c0_i32 = arith.constant 0 : i32
    %c0_i32_0 = arith.constant 0 : i32
    %c0_i32_1 = arith.constant 0 : i32
    return %arg1, %c0_i32, %c0_i32_0 : i32, i32, i32
  }
  func.func @transform_15(%arg0: i32, %arg1: i32) -> (i32, i32, i32) {
    %c0_i32 = arith.constant 0 : i32
    %c0_i32_0 = arith.constant 0 : i32
    %c0_i32_1 = arith.constant 0 : i32
    return %arg0, %c0_i32, %c0_i32_0 : i32, i32, i32
  }
}

</mosaic_0001>

<bundles_post_ra>
// kernel: encoder_forward.1
= control target key start
LH: loop header
LB: loop body
LE: loop exit
PB: predicated region body
PF: predicated region fallthrough
CT: control target
= control target key end

     0   :  { %s2431_s0 = inlined_call_operand.vmem [shape: f32[2,8,32], index: 0, kind: input, shape index: {}]   ;;  %s2432_s1 = inlined_call_operand.vmem [shape: f32[8,32], index: 1, kind: input, shape index: {}]   ;;  %s2433_s2 = inlined_call_operand.vmem [shape: f32[2,1,8], index: 2, kind: input, shape index: {}]   ;;  %s2434_s3 = inlined_call_operand.vmem [shape: f32[1,32], index: 3, kind: input, shape index: {}]   ;;  %s2435_s4 = inlined_call_operand.vmem [shape: f32[1,32], index: 4, kind: input, shape index: {}]   ;;  %s2436_s5 = inlined_call_operand.vmem [shape: f32[2,32,96], index: 5, kind: input, shape index: {}]   ;;  %s2437_s6 = inlined_call_operand.vmem [shape: f32[2,32,32], index: 6, kind: input, shape index: {}]   ;;  %s2438_s7 = inlined_call_operand.vmem [shape: f32[2,1,32], index: 7, kind: input, shape index: {}]   ;;  %s2439_s8 = inlined_call_operand.vmem [shape: f32[2,1,32], index: 8, kind: input, shape index: {}]   ;;  %s2440_s9 = inlined_call_operand.vmem [shape: f32[2,32,64], index: 9, kind: input, shape index: {}]   ;;  %s2441_s10 = inlined_call_operand.vmem [shape: f32[2,1,64], index: 10, kind: input, shape index: {}]   ;;  %s2442_s11 = inlined_call_operand.vmem [shape: f32[2,64,32], index: 11, kind: input, shape index: {}]   ;;  %s2443_s12 = inlined_call_operand.vmem [shape: f32[2,1,32], index: 12, kind: input, shape index: {}]   ;;  %s2444_s13 = inlined_call_operand.vmem [shape: f32[2,1,32], index: 13, kind: input, shape index: {}]   ;;  %s2445_s14 = inlined_call_operand.vmem [shape: f32[2,1,32], index: 14, kind: input, shape index: {}]   ;;  %s2446_s15 = inlined_call_operand.hbm [shape: f32[2,8,32], index: 15, kind: output, shape index: {}]  }
   0x1   :  { %2463 = sst [smem:[#allocation19_spill]] %s2431_s0 }
   0x2   :  { %2464 = sst [smem:[#allocation20_spill]] %s2432_s1 }
   0x3   :  { %2465 = sst [smem:[#allocation21_spill]] %s2434_s3 }
   0x4   :  { %2466 = sst [smem:[#allocation22_spill]] %s2435_s4 }
   0x5   :  { %2467 = sst [smem:[#allocation23_spill]] %s2436_s5 }
   0x6   :  { %2468 = sst [smem:[#allocation24_spill]] %s2437_s6 }
   0x7   :  { %2469 = sst [smem:[#allocation25_spill]] %s2446_s15 }
   0x8   :  { %20 = vsyncpa [#allocation3], 0 }
   0x9   :  { %22 = vsyncpa [#allocation3 + $0x1], 0  ;;  %s2111_s18 = smov 0   ;;  %s2113_s19 = smov 0  }
   0xa   :  { %s2115_s20 = smov 0   ;;  %s2117_s21 = smov 0  }
   0xb   :  { %s2119_s22 = smov 0   ;;  %s2121_s23 = smov 0  }
   0xc   :  { %s2123_s24 = smov 0   ;;  %s2125_s25 = smov 0  }
   0xd LB: > { %2470 = sst [smem:[#allocation5_spill]] %s1991_s18  ;;  %s1654_s26 = sadd.s32 4294967295, %s2019_s25   ;;  %s2019_s25 = sphi %s2125_s25, %s28_s25   ;;  %s2015_s24 = sphi %s2123_s24, %s2512_s24   ;;  %s2011_s23 = sphi %s2121_s23, %s2511_s23   ;;  %s2007_s22 = sphi %s2119_s22, %s2510_s22   ;;  %s2003_s21 = sphi %s2117_s21, %s2509_s21   ;;  %s1999_s20 = sphi %s2115_s20, %s2508_s20   ;;  %s1995_s19 = sphi %s2113_s19, %s2507_s19   ;;  %s1991_s18 = sphi %s2111_s18, %s2506_s18  }
   0xe   : > { %2471 = sst [smem:[#allocation6_spill]] %s1995_s19  ;;  %s1655_s27 = sadd.s32 4294967294, %s2019_s25  }
   0xf   : > { %2472 = sst [smem:[#allocation7_spill]] %s1999_s20  ;;  %s37_s28 = sadd.s32 1, %s2011_s23 }
  0x10   : > { %2473 = sst [smem:[#allocation8_spill]] %s2003_s21  ;;  %p38_p0 = scmp.ge.s32.totalorder %s37_s28, 2 }
  0x11   : > { %2474 = sst [smem:[#allocation9_spill]] %s2007_s22  ;;  %s40_s29 = sadd.s32 1, %s2015_s24 }
  0x12   : > { %2475 = sst [smem:[#allocation10_spill]] %s2011_s23  ;;  %p432_p1 = scmp.ne.s32.totalorder %s1999_s20, %s1995_s19 }
  0x13   : > { %2476 = sst [smem:[#allocation11_spill]] %s2015_s24  ;;  %p433_p2 = scmp.eq.s32.totalorder %s1654_s26, 3 }
  0x14   : > { %2477 = sst [smem:[#allocation12_spill]] %s2019_s25  ;;  %s2514_s28 = smov (%p38_p0, %s37_s28), 0 }
  0x15   : > { %2478 = sst [smem:[#allocation13_spill]] %s2514_s28  ;;  %s2516_s29 = smov (!%p38_p0, %s40_s29), %s2015_s24 }
  0x16   : > { %p2160_p3 = por %p433_p2, %p432_p1  ;;  %p438_p4 = scmp.ne.s32.totalorder %s1995_s19, %s1991_s18 }
  0x17   : > { %p42_p5 = scmp.ge.s32.totalorder %s2516_s29, 2  ;;  %p439_p6 = scmp.eq.s32.totalorder %s1655_s27, 3 }
  0x18   : > { %s2479_s30 = scalar_select %p2160_p3, 1, 0 }
  0x19   : > { %p1658_p7 = scmp.ge.s32.totalorder %s2019_s25, 1  ;;  %p547_p8 = scmp.lt.s32.totalorder %s2019_s25, 5 }
  0x1a   : > { %2480 = sst [smem:[#allocation14_spill]] %s2479_s30  ;;  %s2518_s29 = smov (%p42_p5, %s2516_s29), 0 }
  0x1b   : > { %2481 = sst [smem:[#allocation15_spill]] %s2518_s29  ;;  %p2170_p9 = por %p439_p6, %p438_p4 }
  0x1c   : > { %p548_p10 = pnand %p1658_p7, %p547_p8  ;;  %s419_s17 = ssub.s32 %s2015_s24, %s2518_s29 }
  0x1d   : > { %s2482_s16 = scalar_select %p2170_p9, 1, 0 }
  0x1e   : > { %s422_s26 = sadd.s32 1, %s1999_s20  ;;  %p420_p11 = scmp.eq.s32.totalorder %s419_s17, 0 }
  0x1f   : > { %2483 = sst [smem:[#allocation16_spill]] %s2482_s16  ;;  %551 = sbr.rel (%p548_p10) target bundleno = 2869 (0xb35), region = 80 }
  0x20   : > { %s2178_s28 = scalar_select %p420_p11, %s1999_s20, %s422_s26  }
  0x22   : > { %2484 = sst [smem:[#allocation17_spill]] %s2178_s28 }
  0x26   : > { %s2451_s27 = sand.u32 1, %s1995_s19   ;;  %p635_p12 = scmp.lt.s32.totalorder %s2007_s22, 1 }
  0x27   : > { %s1659_s23 = sshll.u32 %s2451_s27, 3  ;;  %p642_p13 = scmp.lt.s32.totalorder %s2003_s21, 1 }
  0x28   : > { %s2186_s18 = scalar_select %p635_p12, %s2007_s22, 1 }
  0x29   : > { %s2189_s29 = scalar_select %p642_p13, %s2003_s21, 1 }
  0x2a   : > { %s1660_s17 = sshll.u32 %s2186_s18, 3  ;;  %s2485_s0 = sld [smem:[#allocation19_spill]] }
  0x2b   : > { %s1693_s25 = sshll.u32 %s2189_s29, 5  ;;  %s2486_s5 = sld [smem:[#allocation23_spill]] }
  0x2c   : > { %s2487_s6 = sld [smem:[#allocation24_spill]]  ;;  %s1696_s4 = sshll.u32 %s2189_s29, 6 }
  0x2d   : > { %s2235_s24 = scalar_lea.vmem %s2442_s11, %s1696_s4  ;;  %s676_s28 = scalar_lea.vmem %s2444_s13, %s2189_s29 }
  0x2e   : > { %s679_s20 = scalar_lea.vmem %s2445_s14, %s2189_s29  ;;  %s2245_s15 = scalar_lea.vmem [#allocation2], %s1659_s23 }
  0x2f   : > { %s2489_s30 = sld [smem:[#allocation8_spill]] }
  0x30   : > { %s638_s16 = scalar_lea.vmem %s2485_s0, %s1660_s17  ;;  %s2221_s0 = scalar_lea.vmem %s2440_s9, %s1693_s25 }
  0x31   : > { %s2203_s19 = scalar_lea.vmem %s2486_s5, %s1693_s25  ;;  %s665_s5 = scalar_lea.vmem %s2441_s10, %s2189_s29 }
  0x32   : > { %s2208_s3 = scalar_lea.vmem %s2487_s6, %s1693_s25 }
  0x33   : > { %2488 = sst [smem:[#allocation18_spill]] %s2208_s3 }
  0x35   : > { %p1669_p0 = scmp.ne.s32.totalorder %s2489_s30, 0 }
  0x36   : > { %v684_v0 = vld [vmem:[%s638_s16] sm:$0xff] (!%p1669_p0)  ;;  %s2490_s3 = sld [smem:[#allocation20_spill]] (!%p1669_p0)  ;;  %vm689_vm0 = vcmask (!%p1669_p0), 261120   ;;  %s2491_s16 = sld [smem:[#allocation21_spill]] (!%p1669_p0) }
  0x37   : > { %683 = sbr.rel (%p1669_p0) target bundleno = 377 (0x179), region = 84  ;;  %s2492_s21 = sld [smem:[#allocation22_spill]] (!%p1669_p0) }
  0x3c   : > { %v685_v1 = vld [vmem:[%s2490_s3] sm:$0xff] (!%p1669_p0) }
  0x3d   : > { %v686_v2 = vadd.f32 (!%p1669_p0), %v685_v1, %v684_v0  ;;  %v1670_v13 = vld [vmem:[%s2491_s16] ss:$0 sm:$0xff] (!%p1669_p0) }
  0x3e   : > { %v1671_v15 = vld [vmem:[%s2492_s21] ss:$0 sm:$0xff] }
  0x3f   : > { %v690_v3 = vsel %vm689_vm0, %v686_v2, 0.0 }
  0x40   : > { %691 = vadd.xlane.f32.xlu0 %v690_v3 }
  0xcd   : > { %v692_v4 = vpop.xlane.xlu0 %691 }
  0xce   : > { %v694_v5 = vmul.f32 0.03125, %v692_v4 }
  0xd0   : > { %v695_v6 = vsub.f32 %v686_v2, %v694_v5 }
  0xd2   : > { %v696_v7 = vmul.f32 %v695_v6, %v695_v6 }
  0xd4   : > { %v697_v8 = vsel %vm689_vm0, %v696_v7, 0.0 }
  0xd5   : > { %698 = vadd.xlane.f32.xlu0 %v697_v8 }
 0x162   : > { %v699_v9 = vpop.xlane.xlu0 %698 }
 0x163   : > { %v700_v10 = vmul.f32 0.03125, %v699_v9 }
 0x165   : > { %v701_v11 = vadd.f32 1e-06, %v700_v10 }
 0x167   : > { %1911 = vrsqrt.f32 %v701_v11 }
 0x171   : > { %v1912_v12 = vpop.eup %1911 }
 0x172   : > { %v703_v14 = vmul.f32 %v1912_v12, %v695_v6 }
 0x174   : > { %v710_v16 = vmul.f32 %v1670_v13, %v703_v14 }
 0x176   : > { %v717_v17 = vadd.f32 %v1671_v15, %v710_v16 }
 0x178   : > { %718 = vst.msk [vmem:[%s2245_s15] sm:$0xff] %vm689_vm0, %v717_v17 }
 0x179 PF: > { %v720_v18 = vld [vmem:[%s2203_s19] sm:$0xff]  ;;  %v721_v19 = vld [vmem:[%s2203_s19 + $0x8] sm:$0xff]  ;;  %v722_v20 = vld [vmem:[%s2203_s19 + $0x10] sm:$0xff]  ;;  %v2021_v21 = vmov 0.0|0.0   ;;  %vm2022_vm1 = vmmov 0   ;;  %v2023_v24 = vmov 0.0   ;;  %s2493_s30 = scalar_lea.vmem %s2433_s2, %s2186_s18  ;;  %s2495_s16 = scalar_lea.vmem %s2438_s7, %s2189_s29 }
 0x17a   : > { %1801 = vmatprep.subr.bf16.mxu1 %v2021_v21  ;;  %v1802_v22 = vpack.c.bf16 %v721_v19, %v720_v18  ;;  %v723_v23 = vld [vmem:[%s2203_s19 + $0x18] sm:$0xff]  ;;  %1737 = vmatprep.mubr.msk.f32.mxu1 %vm2022_vm1, %v2023_v24  ;;  %vm724_vm2 = vcmask 261120   ;;  %s2024_s19 = smov 112   ;;  %s2025_s27 = smov 96   ;;  %vm808_vm3 = vcmask 130048   ;;  %vm883_vm4 = vcmask 64512  }
 0x17b   : > { %1750 = vmatprep.subr.mxu0 %v2023_v24  ;;  %1752 = vmatprep.mubr.msk.f32.mxu0 %vm2022_vm1, %v2023_v24  ;;  %v1805_v25 = vpack.c.bf16 %v723_v23, %v722_v20  ;;  %s2026_s26 = smov 80   ;;  %v1673_v32 = vld [vmem:[%s2493_s30] ss:$0 sm:$0xff]  ;;  %s2027_s18 = smov 48   ;;  %vm1354_vm5 = vcmask 523264  }
 0x17c   : > { %1803 = vmatpush3.bf16.msra.mxu1 %v1802_v22  ;;  %s2028_s6 = smov 64   ;;  %s2494_s22 = sld [smem:[#allocation18_spill]]  ;;  %v1254_v23 = vld [vmem:[%s2221_s0] sm:$0xff] }
 0x17d   : > { %1804 = vmatprep.subr.bf16.mxu1 %v2021_v21  ;;  %s2029_s23 = smov 16   ;;  %s2496_s21 = scalar_lea.vmem %s2439_s8, %s2189_s29 }
 0x17e   : > { %s2497_s17 = scalar_lea.vmem %s2443_s12, %s2189_s29  ;;  %s1473_s3 = sshll.u32 %s2245_s15, 4  ;;  %s2376_s3 = int_to_ptr.vmem [resolvable:$true] %s1473_s3 }
 0x17f   : > { %v2273_v26 = vld [vmem:[%s2245_s15] sm:$0xff]  ;;  %s2501_s1 = sld [smem:[#allocation25_spill]]  ;;  %s1925_s29 = scalar_lea.vmem %s2376_s3, 128 }
 0x180   : > { %1806 = vmatpush3.bf16.msra.mxu1 %v1805_v25  ;;  %p1926_p1 = scmp.ne.s32.totalorder %s2376_s3, %s1925_s29 }
 0x181   : > { %1740 = vmatprep.subr.mxu1 %v2023_v24 }
 0x182   : > { %v1147_v1 = vld [vmem:[%s2494_s22] sm:$0xff]  ;;  %v1148_v2 = vld [vmem:[%s2494_s22 + $0x8] sm:$0xff]  ;;  %v1149_v3 = vld [vmem:[%s2494_s22 + $0x10] sm:$0xff]  ;;  %p1927_p2 = pnand %p1926_p1, %p2160_p3 }
 0x183   : > { %1738 = vmatmul.mubr.msk.f32.vlgmr.msra.gmra.mrb[0].mxu1 %vm724_vm2, %v2273_v26  ;;  %v1808_v4 = vpack.c.bf16 %v1148_v2, %v1147_v1  ;;  %v1150_v5 = vld [vmem:[%s2494_s22 + $0x18] sm:$0xff] }
 0x184   : > { %1742 = vmatprep.mubr.msk.f32.mxu1 %vm2022_vm1, %v2023_v24  ;;  %v1811_v6 = vpack.c.bf16 %v1150_v5, %v1149_v3  ;;  %v1687_v5 = vld [vmem:[%s676_s28] ss:$0 sm:$0xff]  ;;  %p1928_p4 = pneg %p1927_p2 }
 0x256   : > { %v794_v27 = vpop.f32.mrb[0].mxu1 }
 0x257   : > { %974 = vrot.lane.b32.xlu1 %v794_v27, %s2024_s19  ;;  %806 = vrot.lane.b32.xlu0 %v794_v27, %s2025_s27  ;;  %v1739_v28 = vpop.f32.mrb[1].mxu1 }
 0x25b   : > { %976 = vrot.lane.b32.xlu0 %v794_v27, %s2026_s26 }
 0x2c9   : > { %v807_v29 = vpop.permute.xlu0 %806  ;;  %v975_v31 = vpop.permute.xlu1 %974 }
 0x2ca   : > { %1741 = vmatpush3.xpose.msk.msra.mxu1 %vm808_vm3, %v807_v29  ;;  %v1339_v29 = vld [vmem:[%s2235_s24] sm:$0xff] }
 0x2cb   : > { %1745 = vmatprep.subr.mxu1 %v2023_v24 }
 0x2cd   : > { %1743 = vmatmul.mubr.msk.f32.vlgmr.msra.gmra.mrb[2].mxu1 %vm808_vm3, %v794_v27  ;;  %v977_v30 = vpop.permute.xlu0 %976 }
 0x2ce   : > { %1751 = vmatpush3.xpose.msk.msra.mxu0 %vm808_vm3, %v977_v30  ;;  %1747 = vmatprep.mubr.msk.f32.mxu1 %vm2022_vm1, %v2023_v24  ;;  %v1340_v30 = vld [vmem:[%s2235_s24 + $0x8] sm:$0xff] }
 0x2cf   : > { %1807 = vmatprep.subr.bf16.mxu0 %v2021_v21 }
 0x2d1   : > { %1753 = vmatmul.mubr.msk.f32.vlgmr.msra.gmra.mrb[0].mxu0 %vm808_vm3, %v975_v31  ;;  %v1341_v31 = vld [vmem:[%s2235_s24 + $0x10] sm:$0xff] }
 0x2d2   : > { %1768 = vmatprep.mubr.msk.f32.mxu0 %vm2022_vm1, %v2023_v24  ;;  %1809 = vmatpush3.bf16.msra.mxu0 %v1808_v4 }
 0x2d3   : > { %1810 = vmatprep.subr.bf16.mxu0 %v2021_v21 }
 0x2d6   : > { %1812 = vmatpush3.bf16.msra.mxu0 %v1811_v6 }
 0x2d7   : > { %1819 = vmatprep.subr.bf16.mxu0 %v2021_v21 }
 0x3a0   : > { %v879_v33 = vpop.f32.mrb[2].mxu1 }
 0x3a1   : > { %v880_v34 = vadd.f32 %v1673_v32, %v879_v33  ;;  %v1744_v35 = vpop.f32.mrb[3].mxu1  ;;  %v1342_v33 = vld [vmem:[%s2235_s24 + $0x18] sm:$0xff] }
 0x3a2   : > { %v1343_v35 = vld [vmem:[%s2235_s24 + $0x20] sm:$0xff] }
 0x3a3   : > { %v884_v36 = vsel %vm883_vm4, %v880_v34, -inf }
 0x3a4   : > { %v1048_v37 = vpop.f32.mrb[0].mxu0  ;;  %885 = vmax.xlane.f32.xlu1 %v884_v36  ;;  %v1344_v36 = vld [vmem:[%s2235_s24 + $0x28] sm:$0xff] }
 0x3a5   : > { %v1049_v38 = vadd.f32 %v1673_v32, %v1048_v37  ;;  %v1754_v39 = vpop.f32.mrb[1].mxu0  ;;  %v1820_v32 = vpack.c.bf16 %v1340_v30, %v1339_v29  ;;  %v1826_v37 = vpack.c.bf16 %v1344_v36, %v1343_v35 }
 0x3a7   : > { %v1052_v40 = vsel %vm883_vm4, %v1049_v38, -inf }
 0x3a8   : > { %1053 = vmax.xlane.f32.xlu0 %v1052_v40 }
 0x431   : > { %v886_v41 = vpop.xlane.xlu1 %885 }
 0x432   : > { %v887_v42 = vsub.f32 %v880_v34, %v886_v41  ;;  %v1823_v34 = vpack.c.bf16 %v1342_v33, %v1341_v31 }
 0x434   : > { %v888_v43 = vmul.f32 1.442695, %v887_v42  ;;  %v1681_v42 = vld [vmem:[%s2495_s16] ss:$0 sm:$0xff] }
 0x435   : > { %v1054_v44 = vpop.xlane.xlu0 %1053 }
 0x436   : > { %1913 = vpow2.f32 %v888_v43  ;;  %v1055_v45 = vsub.f32 %v1049_v38, %v1054_v44  ;;  %v1682_v44 = vld [vmem:[%s2496_s21] ss:$0 sm:$0xff] }
 0x438   : > { %v1056_v46 = vmul.f32 1.442695, %v1055_v45 }
 0x43a   : > { %1915 = vpow2.f32 %v1056_v46  ;;  %v1345_v46 = vld [vmem:[%s2235_s24 + $0x30] sm:$0xff] }
 0x440   : > { %v1914_v47 = vpop.eup %1913 }
 0x441   : > { %v890_v48 = vsel %vm883_vm4, %v1914_v47, 0.0 }
 0x442   : > { %891 = vadd.xlane.f32.xlu0 %v890_v48 }
 0x444   : > { %v1916_v49 = vpop.eup %1915 }
 0x445   : > { %v1058_v50 = vsel %vm883_vm4, %v1916_v49, 0.0 }
 0x446   : > { %1059 = vadd.xlane.f32.xlu1 %v1058_v50 }
 0x457   : > { %1066 = vrot.lane.b32.xlu1 %v794_v27, %s2027_s18 }
 0x458   : > { %898 = vrot.lane.b32.xlu0 %v794_v27, %s2028_s6  ;;  %v1257_v27 = vld [vmem:[%s2221_s0 + $0x18] sm:$0xff] }
 0x4cf   : > { %v892_v51 = vpop.xlane.xlu0 %891 }
 0x4d0   : > { %1917 = vrcp.f32 %v892_v51 }
 0x4d3   : > { %v899_v52 = vpop.permute.xlu0 %898  ;;  %v1060_v53 = vpop.xlane.xlu1 %1059 }
 0x4d4   : > { %1919 = vrcp.f32 %v1060_v53  ;;  %1746 = vmatpush3.msra.mxu1 %v899_v52 }
 0x4d5   : > { %1755 = vmatprep.subr.mxu1 %v2023_v24 }
 0x4d7   : > { %v1067_v63 = vpop.permute.xlu1 %1066 }
 0x4da   : > { %v1918_v54 = vpop.eup %1917 }
 0x4db   : > { %v894_v55 = vmul.f32 %v1918_v54, %v892_v51 }
 0x4dd   : > { %v895_v56 = vsub.f32 2.0, %v894_v55 }
 0x4de   : > { %v1920_v57 = vpop.eup %1919 }
 0x4df   : > { %v896_v58 = vmul.f32 %v1918_v54, %v895_v56  ;;  %v1062_v59 = vmul.f32 %v1920_v57, %v1060_v53  ;;  %v1685_v54 = vld [vmem:[%s2497_s17] ss:$0 sm:$0xff] }
 0x4e1   : > { %v897_v60 = vmul.f32 %v1914_v47, %v896_v58  ;;  %v1063_v61 = vsub.f32 2.0, %v1062_v59  ;;  %v1346_v47 = vld [vmem:[%s2235_s24 + $0x38] sm:$0xff]  ;;  %s2499_s24 = sld [smem:[#allocation6_spill]] }
 0x4e2   : > { %v1829_v48 = vpack.c.bf16 %v1346_v47, %v1345_v46 }
 0x4e3   : > { %v1064_v62 = vmul.f32 %v1920_v57, %v1063_v61  ;;  %1748 = vmatmul.mubr.msk.f32.vlgmr.msra.gmra.mrb[4].mxu1 %vm883_vm4, %v897_v60 }
 0x4e4   : > { %1756 = vmatpush3.msra.mxu1 %v1067_v63  ;;  %1757 = vmatprep.mubr.msk.f32.mxu1 %vm2022_vm1, %v2023_v24 }
 0x4e5   : > { %v1065_v0 = vmul.f32 %v1916_v49, %v1064_v62  ;;  %1813 = vmatprep.subr.bf16.mxu1 %v2021_v21  ;;  %v1683_v49 = vld [vmem:[%s665_s5] ss:$0 sm:$0xff]  ;;  %s2498_s5 = sld [smem:[#allocation9_spill]] }
 0x4e7   : > { %1758 = vmatmul.mubr.msk.f32.vlgmr.msra.gmra.mrb[6].mxu1 %vm883_vm4, %v1065_v0  ;;  %s2502_s28 = sand.u32 1, %s2499_s24  }
 0x4e8   : > { %1779 = vmatprep.mubr.msk.f32.mxu1 %vm2022_vm1, %v2023_v24  ;;  %s1460_s19 = scalar_lea.sflag [#allocation3], %s2502_s28 }
 0x5b6   : > { %v970_v7 = vpop.f32.mrb[4].mxu1 }
 0x5b7   : > { %v1749_v8 = vpop.f32.mrb[5].mxu1 }
 0x5ba   : > { %v1138_v9 = vpop.f32.mrb[6].mxu1 }
 0x5bb   : > { %1143 = vrot.lane.b32.xlu1 %v1138_v9, %s2029_s23  ;;  %v1759_v10 = vpop.f32.mrb[7].mxu1 }
 0x62d   : > { %v1144_v11 = vpop.permute.xlu1 %1143 }
 0x62e   : > { %v1146_v12 = vsel %vm808_vm3, %v970_v7, %v1144_v11  ;;  %v1688_v7 = vld [vmem:[%s679_s20] ss:$0 sm:$0xff]  ;;  %s2030_s20 = smov [#allocation2]  }
 0x62f   : > { %1769 = vmatmul.mubr.msk.f32.vlgmr.msra.gmra.mrb[2].mxu0 %vm724_vm2, %v1146_v12  ;;  %s1929_s27 = sshll.u32 %s2030_s20, 4  ;;  %s1930_s27 = int_to_ptr.vmem [resolvable:$false] %s1929_s27 }
 0x630   : > { %1798 = vmatprep.mubr.msk.f32.mxu0 %vm2022_vm1, %v2023_v24  ;;  %v1255_v24 = vld [vmem:[%s2221_s0 + $0x8] sm:$0xff]  ;;  %1821 = vmatpush3.bf16.msra.mxu0 %v1820_v32  ;;  %s1931_s26 = scalar_lea.vmem %s1930_s27, 256  ;;  %p1932_p5 = scmp.lt.s32.totalorder %s2376_s3, %s1930_s27 }
 0x631   : > { %v1814_v25 = vpack.c.bf16 %v1255_v24, %v1254_v23  ;;  %1822 = vmatprep.subr.bf16.mxu0 %v2021_v21  ;;  %p1933_p6 = scmp.lt.s32.totalorder %s1931_s26, %s1925_s29 }
 0x633   : > { %1815 = vmatpush3.bf16.msra.mxu1 %v1814_v25  ;;  %p1934_p7 = por %p1933_p6, %p1932_p5 }
 0x634   : > { %1816 = vmatprep.subr.bf16.mxu1 %v2021_v21  ;;  %1824 = vmatpush3.bf16.msra.mxu0 %v1823_v34 }
 0x635   : > { %1825 = vmatprep.subr.bf16.mxu0 %v2021_v21  ;;  %p1935_p8 = pnand %p1934_p7, %p1928_p4 }
 0x638   : > { %1827 = vmatpush3.bf16.msra.mxu0 %v1826_v37 }
 0x639   : > { %1828 = vmatprep.subr.bf16.mxu0 %v2021_v21 }
 0x63c   : > { %1830 = vmatpush3.bf16.msra.mxu0 %v1829_v48 }
 0x702   : > { %v1220_v13 = vpop.f32.mrb[2].mxu0 }
 0x703   : > { %v1221_v14 = vadd.f32 %v1220_v13, %v2273_v26  ;;  %v1770_v15 = vpop.f32.mrb[3].mxu0  ;;  %v1256_v26 = vld [vmem:[%s2221_s0 + $0x10] sm:$0xff]  ;;  %s1690_s0 = sshll.u32 %s2498_s5, 7 }
 0x704   : > { %v1817_v28 = vpack.c.bf16 %v1257_v27, %v1256_v26  ;;  %s2374_s21 = scalar_lea.hbm %s2501_s1, %s1690_s0 }
 0x705   : > { %v1226_v16 = vsel %vm724_vm2, %v1221_v14, 0.0 }
 0x706   : > { %1227 = vadd.xlane.f32.xlu0 %v1226_v16  ;;  %1818 = vmatpush3.bf16.msra.mxu1 %v1817_v28 }
 0x793   : > { %v1228_v17 = vpop.xlane.xlu0 %1227 }
 0x794   : > { %v1230_v18 = vmul.f32 0.03125, %v1228_v17 }
 0x796   : > { %v1231_v19 = vsub.f32 %v1221_v14, %v1230_v18 }
 0x798   : > { %v1232_v20 = vmul.f32 %v1231_v19, %v1231_v19 }
 0x79a   : > { %v1233_v22 = vsel %vm724_vm2, %v1232_v20, 0.0 }
 0x79b   : > { %1234 = vadd.xlane.f32.xlu1 %v1233_v22 }
 0x828   : > { %v1235_v38 = vpop.xlane.xlu1 %1234 }
 0x829   : > { %v1236_v39 = vmul.f32 0.03125, %v1235_v38 }
 0x82b   : > { %v1237_v40 = vadd.f32 1e-06, %v1236_v39 }
 0x82d   : > { %1921 = vrsqrt.f32 %v1237_v40 }
 0x837   : > { %v1922_v41 = vpop.eup %1921 }
 0x838   : > { %v1239_v43 = vmul.f32 %v1922_v41, %v1231_v19 }
 0x83a   : > { %v1246_v45 = vmul.f32 %v1681_v42, %v1239_v43 }
 0x83c   : > { %v1253_v21 = vadd.f32 %v1682_v44, %v1246_v45 }
 0x83e   : > { %1780 = vmatmul.mubr.msk.f32.vlgmr.msra.gmra.mrb[8].mxu1 %vm724_vm2, %v1253_v21 }
 0x911   : > { %v1334_v50 = vpop.f32.mrb[8].mxu1 }
 0x912   : > { %v1335_v51 = vadd.f32 %v1683_v49, %v1334_v50  ;;  %v1781_v52 = vpop.f32.mrb[9].mxu1 }
 0x914   : > { %v1338_v53 = vmax.f32 %v1335_v51, 0.0 }
 0x916   : > { %1799 = vmatmul.mubr.msk.f32.vlgmr.msra.gmra.mrb[4].mxu0 %vm1354_vm5, %v1338_v53 }
 0x9e9   : > { %v1424_v55 = vpop.f32.mrb[4].mxu0 }
 0x9ea   : > { %v1425_v56 = vadd.f32 %v1685_v54, %v1424_v55  ;;  %v1800_v57 = vpop.f32.mrb[5].mxu0 }
 0x9ec   : > { %v1428_v58 = vadd.f32 %v1425_v56, %v1253_v21 }
 0x9ee   : > { %v1431_v59 = vsel %vm724_vm2, %v1428_v58, 0.0 }
 0x9ef   : > { %1432 = vadd.xlane.f32.xlu0 %v1431_v59 }
 0xa7c   : > { %v1433_v60 = vpop.xlane.xlu0 %1432 }
 0xa7d   : > { %v1434_v61 = vmul.f32 0.03125, %v1433_v60 }
 0xa7f   : > { %v1435_v62 = vsub.f32 %v1428_v58, %v1434_v61 }
 0xa81   : > { %v1436_v63 = vmul.f32 %v1435_v62, %v1435_v62 }
 0xa83   : > { %v1437_v0 = vsel %vm724_vm2, %v1436_v63, 0.0 }
 0xa84   : > { %1438 = vadd.xlane.f32.xlu0 %v1437_v0 }
 0xb11   : > { %v1439_v1 = vpop.xlane.xlu0 %1438 }
 0xb12   : > { %v1440_v2 = vmul.f32 0.03125, %v1439_v1 }
 0xb14   : > { %v1441_v3 = vadd.f32 1e-06, %v1440_v2 }
 0xb16   : > { %1923 = vrsqrt.f32 %v1441_v3 }
 0xb20   : > { %v1924_v4 = vpop.eup %1923 }
 0xb21   : > { %v1443_v6 = vmul.f32 %v1924_v4, %v1435_v62 }
 0xb23   : > { %v1450_v8 = vmul.f32 %v1687_v5, %v1443_v6 }
 0xb25   : > { %v1457_v9 = vadd.f32 %v1688_v7, %v1450_v8 }
 0xb27   : > { %1458 = vst.msk [vmem:[%s2245_s15] sm:$0xff] %vm724_vm2, %v1457_v9 }
 0xb28   : > { %1938 = shalt.err (!%p1935_p8)
}
 0xb29   : > { %s1939_s15 = scalar_lea.hbm %s2374_s21, 128  ;;  %s1943_s5 = scalar_lea.hbm %s2501_s1, 256 }
 0xb2a   : > { %p1940_p10 = scmp.ne.s32.totalorder %s2374_s21, %s1939_s15  ;;  %p1944_p13 = scmp.lt.u32.totalorder %s2374_s21, %s2501_s1 }
 0xb2b   : > { %p1945_p0 = scmp.lt.u32.totalorder %s1943_s5, %s1939_s15  ;;  %p1947_p2 = scmp.lt.u32.totalorder %s1939_s15, %s2374_s21 }
 0xb2c   : > { %p1941_p11 = pnand %p1940_p10, %p2160_p3 }
 0xb2d   : > { %p1946_p1 = por %p1945_p0, %p1944_p13 }
 0xb2e   : > { %p1942_p12 = pneg %p1941_p11 }
 0xb2f   : > { %p1948_p4 = por %p1947_p2, %p1946_p1 }
 0xb31   : > { %p1949_p5 = pnand %p1948_p4, %p1942_p12 }
 0xb33   : > { %1952 = shalt.err (!%p1949_p5)
}
 0xb34   : > { %1831 = dma.vmem_to_hbm [thread:$0]  (%p2160_p3), %s2376_s3, 128, %s2374_s21, %s1460_s19  }
 0xb35 PF: > { %s2503_s6 = sld [smem:[#allocation12_spill]]  ;;  %s2504_s22 = sld [smem:[#allocation5_spill]] }
 0xb3b   : > { %p1837_p6 = scmp.ge.s32.totalorder %s2503_s6, 2  ;;  %s1485_s0 = sand.u32 1, %s2504_s22  }
 0xb3c   : > { %s1486_s16 = scalar_lea.sflag [#allocation3], %s1485_s0 }
 0xb3d   : > { %p1834_p7 = pnand %p1837_p6, %p2170_p9 }
 0xb3f   : > { %1986 = dma.done.wait (!%p1834_p7), %s1486_s16, 128  }
 0xb40   : > { %1988 = vsyncadd (!%p1834_p7), %s1486_s16, 4294967168  ;;  %s28_s25 = sadd.s32 1, %s2503_s6   ;;  %s2506_s18 = sld [smem:[#allocation6_spill]] }
 0xb41   : > { %p25_p8 = scmp.ge.s32.totalorder %s28_s25, 6   ;;  %s2507_s19 = sld [smem:[#allocation7_spill]] }
 0xb42   : > { %s2508_s20 = sld [smem:[#allocation17_spill]]  ;;  %s2509_s21 = sld [smem:[#allocation10_spill]] }
 0xb43   : > { %s2510_s22 = sld [smem:[#allocation11_spill]]  ;;  %s2511_s23 = sld [smem:[#allocation13_spill]] }
 0xb44   : > { %s2512_s24 = sld [smem:[#allocation15_spill]]  ;;  %27 = sbr.rel (!%p25_p8) target bundleno = 13 (0xd), region = 152 }
 0xb4b   :  { %1491 = vsyncpa [#allocation3], 1 }
 0xb4c   :  { %1493 = vsyncpa [#allocation3 + $0x1], 1 }

</bundles_post_ra>
